<compile_context>
chip_gen: v5e
topology: v5e:2x2
jax: 0.10.0
libtpu: 0.0.40
codegen_flags: <defaults>
</compile_context>

<pallas_src>
import jax
import jax.numpy as jnp
from jax.experimental import pallas as pl
from jax.experimental.pallas import tpu as pltpu


_LANE = 128     # lane (last-dim) alignment
_SUBLANE = 8    # sublane (second-to-last dim) alignment


def _round_up(x, m):
    return (x + m - 1) // m * m


def _vmem_config():
    """Generation-aware (VMEM working-set budget, scoped vmem limit) in bytes."""
    cap = 64 * 1024 * 1024
    try:
        cap = int(pltpu.get_tpu_info().vmem_capacity_bytes)
    except Exception:
        pass
    if cap >= 100 * 1024 * 1024:                  # v5e / v6e: 128 MiB physical VMEM
        return 48 * 1024 * 1024, 96 * 1024 * 1024
    return 20 * 1024 * 1024, 32 * 1024 * 1024     # v7x: 64 MiB physical per TC


def _pick_batch_tile(B, S_sub, S_lane, H_p, compute_dtype, vmem_budget):
    """Largest power-of-two batch tile under the VMEM budget, capped at B//2 so
    the 'parallel' batch grid axis has >= 2 steps (keeps both v7x TCs busy)."""
    wb = jnp.dtype(compute_dtype).itemsize
    # Resident weights: still double-buffered by the BlockSpec pipeline.
    # TODO(synk): single-buffer the weights (pipeline_mode=pl.Buffered(1)) once
    # single-buffered pallas_call operands are verified on this jax version.
    weight_bytes = 2 * 2 * H_p * H_p * wb

    def estimate(tb):
        rows = tb * S_sub
        act_in = 2 * 2 * rows * H_p * wb                        # emb + pos, 2x buffered
        act_out = 2 * (rows * S_lane + 2 * rows * H_p) * 4      # sim/pn/ppn, 2x buffered
        temps = rows * H_p * (6 * 4 + 2 * wb) + rows * S_lane * 4   # h/y/yn/pn/ppn/casts/sim
        return weight_bytes + act_in + act_out + temps

    tb_cap = max(1, B // 2)
    tb = 1
    while tb * 2 <= tb_cap and estimate(tb * 2) <= vmem_budget:
        tb *= 2
    # If even tb=1 exceeds the budget (weight-dominated, very large H) we still
    # run with tb=1.
    # TODO(synk): add a K-reduction / N-tiled weight path ("arbitrary" grid axis
    # + f32 VMEM accumulator) for H where the (H_p, H_p) weights no longer fit.
    return tb


def _proj_sim_kernel(emb_ref, pos_ref, w1t_ref, b1_ref, w2t_ref, b2_ref,
                     sim_ref, pn_ref, ppn_ref):
    """One (TB, S_sub, H_p) batch tile per grid step.

    emb_ref, pos_ref : (TB, S_sub, H_p) compute_dtype  anchor / positive embeddings
    w1t_ref, w2t_ref : (H_p, H_p)       compute_dtype  pre-transposed Linear weights
    b1_ref, b2_ref   : (1, H_p)         f32            biases
    sim_ref          : (TB, S_sub, S_lane) f32         similarity (lane-padded cols)
    pn_ref, ppn_ref  : (TB, S_sub, H_p) f32            L2-normalized projections
    """
    TB, S_sub, H_p = emb_ref.shape
    S_lane = sim_ref.shape[-1]
    cdt = w1t_ref.dtype  # MXU input dtype (bf16 fast path or f32)

    def project_normalize(x_ref):
        # MLP against the resident weights; anchors and positives are two
        # separate passes (no concat / slice VMEM copies).
        x = x_ref[...].reshape(TB * S_sub, H_p)
        h = jnp.dot(x, w1t_ref[...], preferred_element_type=jnp.float32)
        h = jnp.maximum(h + b1_ref[...], 0.0)
        y = jnp.dot(h.astype(cdt), w2t_ref[...], preferred_element_type=jnp.float32)
        y = y + b2_ref[...]
        # L2 normalize along hidden axis (1e-24 clamp guards all-zero rows).
        inv_norm = jax.lax.rsqrt(
            jnp.maximum(jnp.sum(y * y, axis=-1, keepdims=True), 1e-24))
        return (y * inv_norm).reshape(TB, S_sub, H_p)

    pn = project_normalize(emb_ref)
    ppn = project_normalize(pos_ref)
    pn_ref[...] = pn
    ppn_ref[...] = ppn

    # Batched similarity: contract the hidden axes directly (no transposed copy).
    # Kept in f32 (tiny matmul) so diag(sim) stays ~1 on the bf16 MLP path.
    sim = jnp.einsum('bqh,bkh->bqk', pn, ppn,
                     preferred_element_type=jnp.float32)   # (TB, S_sub, S_sub)
    if S_lane == S_sub:
        sim_ref[...] = sim
    else:
        # Zero the lane-padded columns so the writeback slab is deterministic.
        sim_ref[...] = jnp.zeros((TB, S_sub, S_lane), jnp.float32)
        sim_ref[:, :, 0:S_sub] = sim


def embedding_pretraining_forward(input_ids, positive_ids, emb_table,
                                  w1, b1, w2, b2,
                                  *, compute_dtype=jnp.bfloat16):
    """Reproduces EmbeddingPretrainingModel.forward(input_ids, positive_ids).

    Returns (embeddings, similarity, projected_norm, positive_projected_norm).
    `compute_dtype` controls the MXU input dtype (bf16 fast path on v5e/v6e/v7x,
    f32 for closer-to-reference numerics); accumulation is always f32.
    """
    B, S = input_ids.shape
    H = emb_table.shape[1]

    # --- glue (XLA): embedding gathers. `embeddings` is a model output anyway.
    # TODO(synk): fold the positive-side gather + pad into the kernel (emb_table
    # in pl.ANY + scalar-prefetched ids + manual DMA gather) to cut one HBM
    # round-trip of the (B, S, H) positive embeddings.
    embeddings = jnp.take(emb_table, input_ids, axis=0)               # (B, S, H) f32
    positive_embeddings = jnp.take(emb_table, positive_ids, axis=0)   # (B, S, H) f32

    # --- padding: S only to the sublane multiple (8) where it is second-to-last;
    # 128 only on lane (last) dims: H everywhere, S on sim's last axis.
    S_sub = _round_up(S, _SUBLANE)
    S_lane = _round_up(S, _LANE)
    H_p = _round_up(H, _LANE)

    vmem_budget, vmem_limit = _vmem_config()
    tb = _pick_batch_tile(B, S_sub, S_lane, H_p, compute_dtype, vmem_budget)
    B_p = _round_up(B, tb)

    # Anchors/positives streamed in the MXU compute dtype (bf16 halves their HBM
    # reads and double-buffered VMEM; zero extra accuracy loss vs in-kernel cast).
    emb_p = jnp.pad(embeddings.astype(compute_dtype),
                    ((0, B_p - B), (0, S_sub - S), (0, H_p - H)))
    pos_p = jnp.pad(positive_embeddings.astype(compute_dtype),
                    ((0, B_p - B), (0, S_sub - S), (0, H_p - H)))

    # Linear weights pre-transposed once on the host (y = x @ W.T + b), zero-
    # padded so padded hidden columns stay exactly zero through the MLP.
    w1t = jnp.pad(w1.T.astype(jnp.float32),
                  ((0, H_p - H), (0, H_p - H))).astype(compute_dtype)
    w2t = jnp.pad(w2.T.astype(jnp.float32),
                  ((0, H_p - H), (0, H_p - H))).astype(compute_dtype)
    b1_p = jnp.pad(b1.astype(jnp.float32), (0, H_p - H)).reshape(1, H_p)
    b2_p = jnp.pad(b2.astype(jnp.float32), (0, H_p - H)).reshape(1, H_p)

    grid_spec = pltpu.PrefetchScalarGridSpec(
        num_scalar_prefetch=0,
        grid=(B_p // tb,),
        in_specs=[
            pl.BlockSpec((tb, S_sub, H_p), lambda i: (i, 0, 0)),   # anchors
            pl.BlockSpec((tb, S_sub, H_p), lambda i: (i, 0, 0)),   # positives
            pl.BlockSpec((H_p, H_p), lambda i: (0, 0)),            # W1^T (resident)
            pl.BlockSpec((1, H_p), lambda i: (0, 0)),              # b1
            pl.BlockSpec((H_p, H_p), lambda i: (0, 0)),            # W2^T (resident)
            pl.BlockSpec((1, H_p), lambda i: (0, 0)),              # b2
        ],
        out_specs=[
            pl.BlockSpec((tb, S_sub, S_lane), lambda i: (i, 0, 0)),  # similarity
            pl.BlockSpec((tb, S_sub, H_p), lambda i: (i, 0, 0)),     # projected_norm
            pl.BlockSpec((tb, S_sub, H_p), lambda i: (i, 0, 0)),     # positive_projected_norm
        ],
    )

    sim_p, pn_p, ppn_p = pl.pallas_call(
        _proj_sim_kernel,
        out_shape=(
            jax.ShapeDtypeStruct((B_p, S_sub, S_lane), jnp.float32),
            jax.ShapeDtypeStruct((B_p, S_sub, H_p), jnp.float32),
            jax.ShapeDtypeStruct((B_p, S_sub, H_p), jnp.float32),
        ),
        grid_spec=grid_spec,
        compiler_params=pltpu.CompilerParams(
            dimension_semantics=("parallel",),
            vmem_limit_bytes=vmem_limit),
    )(emb_p, pos_p, w1t, b1_p, w2t, b2_p)

    # Crop only when padding was actually applied (skip extra copy passes).
    similarity = sim_p if (B_p, S_sub, S_lane) == (B, S, S) else sim_p[:B, :S, :S]
    projected_norm = pn_p if (B_p, S_sub, H_p) == (B, S, H) else pn_p[:B, :S, :H]
    positive_projected_norm = (ppn_p if (B_p, S_sub, H_p) == (B, S, H)
                               else ppn_p[:B, :S, :H])
    return embeddings, similarity, projected_norm, positive_projected_norm


def _reference_forward(input_ids, positive_ids, emb_table, w1, b1, w2, b2):
    """Pure-JAX reference (mirrors the PyTorch forward, f32 throughout)."""
    def project(x):
        h = jnp.maximum(x @ w1.T + b1, 0.0)
        return h @ w2.T + b2

    emb = jnp.take(emb_table, input_ids, axis=0)
    pos_emb = jnp.take(emb_table, positive_ids, axis=0)
    p = project(emb)
    pp = project(pos_emb)
    p_n = p / jnp.linalg.norm(p, axis=2, keepdims=True)
    pp_n = pp / jnp.linalg.norm(pp, axis=2, keepdims=True)
    sim = jnp.einsum('bqh,bkh->bqk', p_n, pp_n)
    return emb, sim, p_n, pp_n


def _check(outs, refs, atol, rtol, tag):
    names = ("embeddings", "similarity", "projected_norm", "positive_projected_norm")
    for name, o, r in zip(names, outs, refs):
        assert o.shape == r.shape, (tag, name, o.shape, r.shape)
        err = float(jnp.max(jnp.abs(o.astype(jnp.float32) - r)))
        assert jnp.allclose(o.astype(jnp.float32), r, atol=atol, rtol=rtol), (tag, name, err)


if __name__ == "__main__":
    # Small, deterministic example shapes.
    B, S, H, V = 2, 8, 32, 64   # batch, seq, hidden, vocab

    key = jax.random.PRNGKey(0)
    k_emb, k_w1, k_b1, k_w2, k_b2, k_ids, k_pos = jax.random.split(key, 7)

    emb_table = jax.random.normal(k_emb, (V, H), dtype=jnp.float32) * 0.02
    w1 = jax.random.normal(k_w1, (H, H), dtype=jnp.float32) * (1.0 / jnp.sqrt(H))
    b1 = jax.random.normal(k_b1, (H,), dtype=jnp.float32) * 0.01
    w2 = jax.random.normal(k_w2, (H, H), dtype=jnp.float32) * (1.0 / jnp.sqrt(H))
    b2 = jax.random.normal(k_b2, (H,), dtype=jnp.float32) * 0.01

    input_ids = jax.random.randint(k_ids, (B, S), 0, V, dtype=jnp.int32)
    positive_ids = jax.random.randint(k_pos, (B, S), 0, V, dtype=jnp.int32)

    refs = _reference_forward(input_ids, positive_ids, emb_table, w1, b1, w2, b2)

    # Tolerances account for TPU matmul-precision differences: XLA's default f32
    # dot may run reduced-precision MXU passes while the Pallas MXU path differs,
    # so even the "f32" comparison is not bit-level.  Structural errors (wrong
    # transpose / bias / normalization) would be O(1), far above these bounds.
    outs_f32 = jax.block_until_ready(embedding_pretraining_forward(
        input_ids, positive_ids, emb_table, w1, b1, w2, b2,
        compute_dtype=jnp.float32))
    _check(outs_f32, refs, atol=2e-2, rtol=2e-2, tag="f32")

    # bf16 MXU fast path: f32 accumulation, looser tolerance.
    outs_bf16 = jax.block_until_ready(embedding_pretraining_forward(
        input_ids, positive_ids, emb_table, w1, b1, w2, b2,
        compute_dtype=jnp.bfloat16))
    _check(outs_bf16, refs, atol=6e-2, rtol=6e-2, tag="bf16")

    # Second config exercising the multi-batch-per-step (TB > 1) tile path.
    B2 = 4
    ids2 = jax.random.randint(jax.random.PRNGKey(1), (B2, S), 0, V, dtype=jnp.int32)
    pos2 = jax.random.randint(jax.random.PRNGKey(2), (B2, S), 0, V, dtype=jnp.int32)
    refs2 = _reference_forward(ids2, pos2, emb_table, w1, b1, w2, b2)
    outs2 = jax.block_until_ready(embedding_pretraining_forward(
        ids2, pos2, emb_table, w1, b1, w2, b2, compute_dtype=jnp.float32))
    _check(outs2, refs2, atol=2e-2, rtol=2e-2, tag="f32_tb2")

    print("KERNEL_OK")
</pallas_src>

<mosaic_0001>
module attributes {stable_mosaic.version = 11 : i64} {
  func.func @_proj_sim_kernel(%arg0: i32, %arg1: memref<1x8x128xf32, #tpu.memory_space<vmem>>, %arg2: memref<1x8x128xf32, #tpu.memory_space<vmem>>, %arg3: memref<128x128xf32, #tpu.memory_space<vmem>>, %arg4: memref<1x128xf32, #tpu.memory_space<vmem>>, %arg5: memref<128x128xf32, #tpu.memory_space<vmem>>, %arg6: memref<1x128xf32, #tpu.memory_space<vmem>>, %arg7: memref<1x8x128xf32, #tpu.memory_space<vmem>>, %arg8: memref<1x8x128xf32, #tpu.memory_space<vmem>>, %arg9: memref<1x8x128xf32, #tpu.memory_space<vmem>>) attributes {dimension_semantics = [#tpu.dimension_semantics<parallel>], iteration_bounds = array<i64: 2>, scalar_prefetch = 0 : i64, scratch_operands = 0 : i64, tpu.core_type = #tpu.core_type<tc>, window_params = [{transform_indices = @transform_0, window_bounds = array<i64: 1, 8, 128>}, {transform_indices = @transform_1, window_bounds = array<i64: 1, 8, 128>}, {pipeline_mode = #tpu.pipeline_mode<synchronous>, transform_indices = @transform_2, window_bounds = array<i64: 128, 128>}, {pipeline_mode = #tpu.pipeline_mode<synchronous>, transform_indices = @transform_3, window_bounds = array<i64: 1, 128>}, {pipeline_mode = #tpu.pipeline_mode<synchronous>, transform_indices = @transform_4, window_bounds = array<i64: 128, 128>}, {pipeline_mode = #tpu.pipeline_mode<synchronous>, transform_indices = @transform_5, window_bounds = array<i64: 1, 128>}, {transform_indices = @transform_6, window_bounds = array<i64: 1, 8, 128>}, {transform_indices = @transform_7, window_bounds = array<i64: 1, 8, 128>}, {transform_indices = @transform_8, window_bounds = array<i64: 1, 8, 128>}]} {
    %c0 = arith.constant 0 : index
    %c0_0 = arith.constant 0 : index
    %c0_1 = arith.constant 0 : index
    %0 = vector.load %arg1[%c0, %c0_0, %c0_1] : memref<1x8x128xf32, #tpu.memory_space<vmem>>, vector<1x8x128xf32>
    %1 = vector.shape_cast %0 : vector<1x8x128xf32> to vector<8x128xf32>
    %c0_2 = arith.constant 0 : index
    %c0_3 = arith.constant 0 : index
    %2 = vector.load %arg3[%c0_2, %c0_3] : memref<128x128xf32, #tpu.memory_space<vmem>>, vector<128x128xf32>
    %cst = arith.constant dense<0.000000e+00> : vector<8x128xf32>
    %3 = tpu.matmul %1, %2, %cst {dimension_numbers = #tpu.dot_dimension_numbers<[1], [0], [0], [1], [0, 0, 1, 1], [], []>} : vector<8x128xf32>, vector<128x128xf32>, vector<8x128xf32> -> vector<8x128xf32>
    %c0_4 = arith.constant 0 : index
    %c0_5 = arith.constant 0 : index
    %4 = vector.load %arg4[%c0_4, %c0_5] : memref<1x128xf32, #tpu.memory_space<vmem>>, vector<1x128xf32>
    %5 = vector.broadcast %4 : vector<1x128xf32> to vector<8x128xf32>
    %6 = arith.addf %3, %5 : vector<8x128xf32>
    %cst_6 = arith.constant 0.000000e+00 : f32
    %7 = vector.broadcast %cst_6 : f32 to vector<8x128xf32>
    %8 = arith.maximumf %6, %7 : vector<8x128xf32>
    %c0_7 = arith.constant 0 : index
    %c0_8 = arith.constant 0 : index
    %9 = vector.load %arg5[%c0_7, %c0_8] : memref<128x128xf32, #tpu.memory_space<vmem>>, vector<128x128xf32>
    %cst_9 = arith.constant dense<0.000000e+00> : vector<8x128xf32>
    %10 = tpu.matmul %8, %9, %cst_9 {dimension_numbers = #tpu.dot_dimension_numbers<[1], [0], [0], [1], [0, 0, 1, 1], [], []>} : vector<8x128xf32>, vector<128x128xf32>, vector<8x128xf32> -> vector<8x128xf32>
    %c0_10 = arith.constant 0 : index
    %c0_11 = arith.constant 0 : index
    %11 = vector.load %arg6[%c0_10, %c0_11] : memref<1x128xf32, #tpu.memory_space<vmem>>, vector<1x128xf32>
    %12 = vector.broadcast %11 : vector<1x128xf32> to vector<8x128xf32>
    %13 = arith.addf %10, %12 : vector<8x128xf32>
    %14 = arith.mulf %13, %13 : vector<8x128xf32>
    %cst_12 = arith.constant dense<0.000000e+00> : vector<8xf32>
    %15 = vector.multi_reduction <add>, %14, %cst_12 [1] : vector<8x128xf32> to vector<8xf32>
    %16 = vector.shape_cast %15 : vector<8xf32> to vector<8x1xf32>
    %cst_13 = arith.constant 1.000000e-24 : f32
    %17 = vector.broadcast %cst_13 : f32 to vector<8x1xf32>
    %18 = arith.maximumf %16, %17 : vector<8x1xf32>
    %19 = math.rsqrt %18 : vector<8x1xf32>
    %20 = vector.broadcast %19 : vector<8x1xf32> to vector<8x128xf32>
    %21 = arith.mulf %13, %20 : vector<8x128xf32>
    %22 = vector.shape_cast %21 : vector<8x128xf32> to vector<1x8x128xf32>
    %c0_14 = arith.constant 0 : index
    %c0_15 = arith.constant 0 : index
    %c0_16 = arith.constant 0 : index
    %23 = vector.load %arg2[%c0_14, %c0_15, %c0_16] : memref<1x8x128xf32, #tpu.memory_space<vmem>>, vector<1x8x128xf32>
    %24 = vector.shape_cast %23 : vector<1x8x128xf32> to vector<8x128xf32>
    %c0_17 = arith.constant 0 : index
    %c0_18 = arith.constant 0 : index
    %25 = vector.load %arg3[%c0_17, %c0_18] : memref<128x128xf32, #tpu.memory_space<vmem>>, vector<128x128xf32>
    %cst_19 = arith.constant dense<0.000000e+00> : vector<8x128xf32>
    %26 = tpu.matmul %24, %25, %cst_19 {dimension_numbers = #tpu.dot_dimension_numbers<[1], [0], [0], [1], [0, 0, 1, 1], [], []>} : vector<8x128xf32>, vector<128x128xf32>, vector<8x128xf32> -> vector<8x128xf32>
    %c0_20 = arith.constant 0 : index
    %c0_21 = arith.constant 0 : index
    %27 = vector.load %arg4[%c0_20, %c0_21] : memref<1x128xf32, #tpu.memory_space<vmem>>, vector<1x128xf32>
    %28 = vector.broadcast %27 : vector<1x128xf32> to vector<8x128xf32>
    %29 = arith.addf %26, %28 : vector<8x128xf32>
    %cst_22 = arith.constant 0.000000e+00 : f32
    %30 = vector.broadcast %cst_22 : f32 to vector<8x128xf32>
    %31 = arith.maximumf %29, %30 : vector<8x128xf32>
    %c0_23 = arith.constant 0 : index
    %c0_24 = arith.constant 0 : index
    %32 = vector.load %arg5[%c0_23, %c0_24] : memref<128x128xf32, #tpu.memory_space<vmem>>, vector<128x128xf32>
    %cst_25 = arith.constant dense<0.000000e+00> : vector<8x128xf32>
    %33 = tpu.matmul %31, %32, %cst_25 {dimension_numbers = #tpu.dot_dimension_numbers<[1], [0], [0], [1], [0, 0, 1, 1], [], []>} : vector<8x128xf32>, vector<128x128xf32>, vector<8x128xf32> -> vector<8x128xf32>
    %c0_26 = arith.constant 0 : index
    %c0_27 = arith.constant 0 : index
    %34 = vector.load %arg6[%c0_26, %c0_27] : memref<1x128xf32, #tpu.memory_space<vmem>>, vector<1x128xf32>
    %35 = vector.broadcast %34 : vector<1x128xf32> to vector<8x128xf32>
    %36 = arith.addf %33, %35 : vector<8x128xf32>
    %37 = arith.mulf %36, %36 : vector<8x128xf32>
    %cst_28 = arith.constant dense<0.000000e+00> : vector<8xf32>
    %38 = vector.multi_reduction <add>, %37, %cst_28 [1] : vector<8x128xf32> to vector<8xf32>
    %39 = vector.shape_cast %38 : vector<8xf32> to vector<8x1xf32>
    %cst_29 = arith.constant 1.000000e-24 : f32
    %40 = vector.broadcast %cst_29 : f32 to vector<8x1xf32>
    %41 = arith.maximumf %39, %40 : vector<8x1xf32>
    %42 = math.rsqrt %41 : vector<8x1xf32>
    %43 = vector.broadcast %42 : vector<8x1xf32> to vector<8x128xf32>
    %44 = arith.mulf %36, %43 : vector<8x128xf32>
    %45 = vector.shape_cast %44 : vector<8x128xf32> to vector<1x8x128xf32>
    %c0_30 = arith.constant 0 : index
    %c0_31 = arith.constant 0 : index
    %c0_32 = arith.constant 0 : index
    %46 = vector.load %arg8[%c0_30, %c0_31, %c0_32] : memref<1x8x128xf32, #tpu.memory_space<vmem>>, vector<1x8x128xf32>
    tpu.vector_store %arg8[%c0_30, %c0_31, %c0_32], %22 {strides = array<i32>} : memref<1x8x128xf32, #tpu.memory_space<vmem>>, vector<1x8x128xf32>,
    %c0_33 = arith.constant 0 : index
    %c0_34 = arith.constant 0 : index
    %c0_35 = arith.constant 0 : index
    %47 = vector.load %arg9[%c0_33, %c0_34, %c0_35] : memref<1x8x128xf32, #tpu.memory_space<vmem>>, vector<1x8x128xf32>
    tpu.vector_store %arg9[%c0_33, %c0_34, %c0_35], %45 {strides = array<i32>} : memref<1x8x128xf32, #tpu.memory_space<vmem>>, vector<1x8x128xf32>,
    "tpu.trace_start"() <{level = 10 : i32, message = "bqh,bkh->bqk"}> : () -> ()
    %cst_36 = arith.constant dense<0.000000e+00> : vector<1x8x8xf32>
    %48 = tpu.matmul %22, %45, %cst_36 {dimension_numbers = #tpu.dot_dimension_numbers<[2], [2], [1], [1], [0, 0, 0, 1, 1, 1], [0], [0]>} : vector<1x8x128xf32>, vector<1x8x128xf32>, vector<1x8x8xf32> -> vector<1x8x8xf32>
    %cst_37 = arith.constant 0.000000e+00 : f32
    "tpu.trace_stop"() : () -> ()
    %49 = vector.broadcast %cst_37 : f32 to vector<1x8x128xf32>
    %c0_38 = arith.constant 0 : index
    %c0_39 = arith.constant 0 : index
    %c0_40 = arith.constant 0 : index
    %50 = vector.load %arg7[%c0_38, %c0_39, %c0_40] : memref<1x8x128xf32, #tpu.memory_space<vmem>>, vector<1x8x128xf32>
    tpu.vector_store %arg7[%c0_38, %c0_39, %c0_40], %49 {strides = array<i32>} : memref<1x8x128xf32, #tpu.memory_space<vmem>>, vector<1x8x128xf32>,
    %c0_41 = arith.constant 0 : index
    %c0_42 = arith.constant 0 : index
    %c0_43 = arith.constant 0 : index
    %51 = vector.load %arg7[%c0_41, %c0_42, %c0_43] : memref<1x8x128xf32, #tpu.memory_space<vmem>>, vector<1x8x8xf32>
    tpu.vector_store %arg7[%c0_41, %c0_42, %c0_43], %48 {strides = array<i32>} : memref<1x8x128xf32, #tpu.memory_space<vmem>>, vector<1x8x8xf32>,
    return
  }
  func.func @transform_0(%arg0: i32) -> (i32, i32, i32) {
    %c0_i32 = arith.constant 0 : i32
    %c0_i32_0 = arith.constant 0 : i32
    %c0_i32_1 = arith.constant 0 : i32
    return %arg0, %c0_i32, %c0_i32_0 : i32, i32, i32
  }
  func.func @transform_1(%arg0: i32) -> (i32, i32, i32) {
    %c0_i32 = arith.constant 0 : i32
    %c0_i32_0 = arith.constant 0 : i32
    %c0_i32_1 = arith.constant 0 : i32
    return %arg0, %c0_i32, %c0_i32_0 : i32, i32, i32
  }
  func.func @transform_2(%arg0: i32) -> (i32, i32) {
    %c0_i32 = arith.constant 0 : i32
    %c0_i32_0 = arith.constant 0 : i32
    %c0_i32_1 = arith.constant 0 : i32
    return %c0_i32, %c0_i32_0 : i32, i32
  }
  func.func @transform_3(%arg0: i32) -> (i32, i32) {
    %c0_i32 = arith.constant 0 : i32
    %c0_i32_0 = arith.constant 0 : i32
    %c0_i32_1 = arith.constant 0 : i32
    return %c0_i32, %c0_i32_0 : i32, i32
  }
  func.func @transform_4(%arg0: i32) -> (i32, i32) {
    %c0_i32 = arith.constant 0 : i32
    %c0_i32_0 = arith.constant 0 : i32
    %c0_i32_1 = arith.constant 0 : i32
    return %c0_i32, %c0_i32_0 : i32, i32
  }
  func.func @transform_5(%arg0: i32) -> (i32, i32) {
    %c0_i32 = arith.constant 0 : i32
    %c0_i32_0 = arith.constant 0 : i32
    %c0_i32_1 = arith.constant 0 : i32
    return %c0_i32, %c0_i32_0 : i32, i32
  }
  func.func @transform_6(%arg0: i32) -> (i32, i32, i32) {
    %c0_i32 = arith.constant 0 : i32
    %c0_i32_0 = arith.constant 0 : i32
    %c0_i32_1 = arith.constant 0 : i32
    return %arg0, %c0_i32, %c0_i32_0 : i32, i32, i32
  }
  func.func @transform_7(%arg0: i32) -> (i32, i32, i32) {
    %c0_i32 = arith.constant 0 : i32
    %c0_i32_0 = arith.constant 0 : i32
    %c0_i32_1 = arith.constant 0 : i32
    return %arg0, %c0_i32, %c0_i32_0 : i32, i32, i32
  }
  func.func @transform_8(%arg0: i32) -> (i32, i32, i32) {
    %c0_i32 = arith.constant 0 : i32
    %c0_i32_0 = arith.constant 0 : i32
    %c0_i32_1 = arith.constant 0 : i32
    return %arg0, %c0_i32, %c0_i32_0 : i32, i32, i32
  }
}

</mosaic_0001>

<bundles_post_ra>
// kernel: tpu_custom_call.1
= control target key start
LH: loop header
LB: loop body
LE: loop exit
PB: predicated region body
PF: predicated region fallthrough
CT: control target
= control target key end

     0   :  { %s1487_s0 = inlined_call_operand.hbm [shape: f32[2,8,128], index: 0, kind: input, shape index: {}]   ;;  %s1488_s1 = inlined_call_operand.hbm [shape: f32[2,8,128], index: 1, kind: input, shape index: {}]   ;;  %s1489_s2 = inlined_call_operand.hbm [shape: f32[128,128], index: 2, kind: input, shape index: {}]   ;;  %s1490_s3 = inlined_call_operand.vmem [shape: f32[1,128], index: 3, kind: input, shape index: {}]   ;;  %s1491_s4 = inlined_call_operand.hbm [shape: f32[128,128], index: 4, kind: input, shape index: {}]   ;;  %s1492_s5 = inlined_call_operand.vmem [shape: f32[1,128], index: 5, kind: input, shape index: {}]   ;;  %s1493_s6 = inlined_call_operand.hbm [shape: f32[2,8,128], index: 6, kind: output, shape index: {0}]   ;;  %s1494_s7 = inlined_call_operand.hbm [shape: f32[2,8,128], index: 7, kind: output, shape index: {1}]   ;;  %s1495_s8 = inlined_call_operand.hbm [shape: f32[2,8,128], index: 8, kind: output, shape index: {2}]  }
   0x1   :  { %1503 = sst [smem:[#allocation25_spill]] %s1489_s2 }
   0x2   :  { %1504 = sst [smem:[#allocation26_spill]] %s1491_s4 }
   0x3   :  { %14 = vsyncpa [#allocation3], 0 }
   0x4   :  { %16 = vsyncpa [#allocation3 + $0x1], 0 }
   0x5   :  { %17 = vsyncpa [#allocation6], 0 }
   0x6   :  { %19 = vsyncpa [#allocation6 + $0x1], 0 }
   0x7   :  { %20 = vsyncpa [#allocation9], 0 }
   0x8   :  { %21 = vsyncpa [#allocation4], 0 }
   0x9   :  { %23 = vsyncpa [#allocation4 + $0x1], 0 }
   0xa   :  { %24 = vsyncpa [#allocation12], 0 }
   0xb   :  { %26 = vsyncpa [#allocation12 + $0x1], 0  ;;  %s1247_s27 = smov 0   ;;  %s1249_s28 = smov 0  }
   0xc   :  { %s1251_s29 = smov 0   ;;  %s1253_s30 = smov 0  }
   0xd LB: > { %1505 = sst [smem:[#allocation20_spill]] %s1191_s29  ;;  %s1271_s12 = sadd.s32 4294967295, %s1195_s30   ;;  %s1195_s30 = sphi %s1253_s30, %s1522_s30   ;;  %s1191_s29 = sphi %s1251_s29, %s1524_s29   ;;  %s1187_s28 = sphi %s1249_s28, %s1526_s28   ;;  %s1183_s27 = sphi %s1247_s27, %s1525_s27  }
   0xe   : > { %1506 = sst [smem:[#allocation21_spill]] %s1195_s30  ;;  %p822_p0 = scmp.ge.s32.totalorder %s1195_s30, 1 }
   0xf   : > { %s1507_s2 = sld [smem:[#allocation25_spill]]  ;;  %p53_p1 = scmp.eq.s32.totalorder %s1271_s12, 0 }
  0x10   : > { %p251_p2 = scmp.lt.s32.totalorder %s1195_s30, 3  ;;  %s1197_s14 = smov [#allocation7]  }
  0x11   : > { %s264_s15 = sshll.u32 %s1197_s14, 4  ;;  %s1509_s4 = sld [smem:[#allocation26_spill]]  ;;  %s265_s15 = int_to_ptr.vmem [resolvable:$true] %s264_s15 }
  0x12   : > { %p1276_p3 = pnand %p822_p0, %p251_p2  ;;  %s1198_s19 = smov [#allocation8]  }
  0x13   : > { %s281_s20 = sshll.u32 %s1198_s19, 4  ;;  %s1199_s21 = smov 128   ;;  %s282_s20 = int_to_ptr.vmem [resolvable:$true] %s281_s20 }
  0x14   : > { %p864_p4 = pneg %p1276_p3  ;;  %s1200_s22 = smov 8  }
  0x15   : > { %s262_s11 = sshll.u32 %s1507_s2, 4  ;;  %s1496_s23 = sadd.s32 4294967294, %s1195_s30   ;;  %s263_s11 = int_to_ptr.hbm [resolvable:$true] %s262_s11 }
  0x16   : > { %p865_p6 = pnand %p864_p4, %p53_p1  ;;  %s1290_s24 = sadd.s32 1, %s1195_s30  }
  0x17   : > { %s279_s18 = sshll.u32 %s1509_s4, 4  ;;  %1510 = sst [smem:[#allocation22_spill]] %s1290_s24  ;;  %s280_s18 = int_to_ptr.hbm [resolvable:$true] %s279_s18 }
  0x18   : > { %867 = dma.hbm_to_vmem [thread:$0]  (!%p865_p6), %s263_s11, 2048, %s265_s15, [#allocation6], %s1199_s21, %s1199_s21, %s1200_s22  }
  0x19   : > { %870 = dma.hbm_to_vmem [thread:$0]  (!%p865_p6), %s280_s18, 2048, %s282_s20, [#allocation9], %s1199_s21, %s1199_s21, %s1200_s22  }
  0x1a   : > { %s36_s25 = ssub.s32 %s1195_s30, %s1290_s24  ;;  %s39_s26 = sadd.s32 1, %s1191_s29 }
  0x1b   : > { %p37_p7 = scmp.eq.s32.totalorder %s36_s25, 0  ;;  %p46_p8 = scmp.ne.s32.totalorder %s1191_s29, %s1187_s28 }
  0x1c   : > { %p47_p9 = scmp.eq.s32.totalorder %s1195_s30, 0  ;;  %p52_p10 = scmp.ne.s32.totalorder %s1187_s28, %s1183_s27 }
  0x1d   : > { %s1301_s9 = scalar_select %p37_p7, %s1191_s29, %s39_s26  }
  0x1e   : > { %p1303_p11 = por %p47_p9, %p46_p8  ;;  %p1309_p12 = por %p53_p1, %p52_p10 }
  0x1f   : > { %1511 = sst [smem:[#allocation23_spill]] %s1301_s9  ;;  %p186_p13 = scmp.eq.s32.totalorder %s1271_s12, 1 }
  0x20   : > { %p192_p0 = scmp.eq.s32.totalorder %s1496_s23, 1  ;;  %p890_p2 = scmp.lt.s32.totalorder %s1195_s30, 2 }
  0x21   : > { %s298_s14 = sand.u32 1, %s1191_s29   ;;  %p1318_p4 = por %p186_p13, %p46_p8 }
  0x22   : > { %p1322_p6 = por %p192_p0, %p52_p10  ;;  %s1326_s17 = sshll.u32 %s298_s14, 3 }
  0x23   : > { %s827_s18 = sshll.u32 %s1195_s30, 3  ;;  %s302_s22 = scalar_lea.vmem [#allocation2], %s1326_s17 }
  0x24   : > { %s1515_s16 = scalar_select %p1322_p6, 1, 0 }
  0x25   : > { %s306_s21 = scalar_lea.hbm %s1487_s0, %s827_s18  ;;  %s310_s25 = sshll.u32 %s302_s22, 4  ;;  %s311_s25 = int_to_ptr.vmem [resolvable:$true] %s310_s25 }
  0x26   : > { %1516 = sst [smem:[#allocation24_spill]] %s1515_s16  ;;  %s308_s26 = sshll.u32 %s306_s21, 4  ;;  %s309_s26 = int_to_ptr.hbm [resolvable:$true] %s308_s26 }
  0x27   : > { %p1335_p7 = pnand %p890_p2, %p1303_p11  ;;  %s325_s9 = scalar_lea.hbm %s1488_s1, %s827_s18 }
  0x28   : > { %s317_s29 = sand.u32 1, %s1195_s30   ;;  %s299_s24 = scalar_lea.sflag [#allocation3], %s298_s14 }
  0x29   : > { %s997_s19 = sshra.s32 %s309_s26, 4  ;;  %p1001_p9 = pneg %p1335_p7  ;;  %s998_s19 = int_to_ptr.hbm [resolvable:$true] %s997_s19 }
  0x2a   : > { %s999_s20 = scalar_lea.hbm %s998_s19, 8  ;;  %s1004_s22 = scalar_lea.hbm %s1487_s0, 16 }
  0x2b   : > { %p1000_p8 = scmp.ne.s32.totalorder %s998_s19, %s999_s20  ;;  %p1005_p13 = scmp.lt.s32.totalorder %s998_s19, %s1487_s0 }
  0x2c   : > { %p1006_p0 = scmp.lt.s32.totalorder %s1004_s22, %s999_s20 }
  0x2d   : > { %p1002_p10 = pnand %p1001_p9, %p1000_p8 }
  0x2e   : > { %p1007_p2 = por %p1006_p0, %p1005_p13 }
  0x2f   : > { %p1003_p11 = pneg %p1002_p10 }
  0x31   : > { %p1008_p5 = pnand %p1007_p2, %p1003_p11 }
  0x33   : > { %1011 = shalt.err (!%p1008_p5)
}
  0x34   : > { %874 = dma.hbm_to_vmem [thread:$0]  (!%p1335_p7), %s309_s26, 128, %s311_s25, %s299_s24  }
  0x35   : > { %s327_s14 = sshll.u32 %s325_s9, 4  ;;  %s321_s18 = scalar_lea.vmem [#allocation5], %s1326_s17  ;;  %s328_s14 = int_to_ptr.hbm [resolvable:$true] %s327_s14 }
  0x36   : > { %s329_s30 = sshll.u32 %s321_s18, 4  ;;  %s318_s10 = scalar_lea.sflag [#allocation6], %s317_s29  ;;  %s330_s30 = int_to_ptr.vmem [resolvable:$true] %s329_s30 }
  0x37   : > { %s1027_s21 = sshra.s32 %s328_s14, 4  ;;  %s1034_s22 = scalar_lea.hbm %s1488_s1, 16  ;;  %s1028_s21 = int_to_ptr.hbm [resolvable:$true] %s1027_s21 }
  0x38   : > { %s1029_s16 = scalar_lea.hbm %s1028_s21, 8  ;;  %p1035_p5 = scmp.lt.s32.totalorder %s1028_s21, %s1488_s1 }
  0x39   : > { %p1030_p8 = scmp.ne.s32.totalorder %s1028_s21, %s1029_s16  ;;  %p1036_p13 = scmp.lt.s32.totalorder %s1034_s22, %s1029_s16 }
  0x3b   : > { %p1032_p10 = pnand %p1030_p8, %p1001_p9  ;;  %p1037_p0 = por %p1036_p13, %p1035_p5 }
  0x3d   : > { %p1033_p11 = pneg %p1032_p10 }
  0x3f   : > { %p1038_p2 = pnand %p1037_p0, %p1033_p11 }
  0x41   : > { %1041 = shalt.err (!%p1038_p2)
}
  0x42   : > { %877 = dma.hbm_to_vmem [thread:$0]  (!%p1335_p7), %s328_s14, 128, %s330_s30, %s318_s10  }
  0x43   : > { %338 = sbr.rel (%p1276_p3) target bundleno = 659 (0x293), region = 44  ;;  %s1371_s29 = sand.u32 (!%p1276_p3), 1, %s1187_s28  }
  0x44   : > { %s1374_s9 = sshll.u32 (!%p1276_p3), %s1371_s29, 3  ;;  %s341_s17 = scalar_lea.sflag (!%p1276_p3), [#allocation3], %s1371_s29 }
  0x45   : > { %s344_s16 = scalar_lea.vmem (!%p1276_p3), [#allocation2], %s1374_s9 }
  0x48   : > { %1158 = dma.done.wait (%p1309_p12), %s341_s17, 128  }
  0x49   : > { %1160 = vsyncadd (%p1309_p12), %s341_s17, 4294967168  ;;  %s350_s30 = sand.u32 1, %s1271_s12   ;;  %s354_s23 = scalar_lea.vmem [#allocation5], %s1374_s9 }
  0x4a   : > { %s351_s13 = scalar_lea.sflag [#allocation6], %s350_s30 }
  0x4b   : > { %1162 = dma.done.wait (%p1309_p12), %s351_s13, 128  }
  0x4c   : > { %1164 = vsyncadd (%p1309_p12), %s351_s13, 4294967168 }
  0x4d   : > { %1166 = dma.done.wait (%p53_p1), [#allocation6], 2048  }
  0x4e   : > { %1168 = vsyncadd (%p53_p1), [#allocation6], 4294965248 }
  0x4f   : > { %1170 = dma.done.wait (%p53_p1), [#allocation9], 2048  }
  0x50   : > { %1172 = vsyncadd (%p53_p1), [#allocation9], 4294965248  ;;  %v429_v0 = vld [vmem:[#allocation7 + $0x78] sm:$0xff]  ;;  %v428_v1 = vld [vmem:[#allocation7 + $0x70] sm:$0xff]  ;;  %s412_s14 = scalar_lea.vmem [#allocation13], %s1374_s9  ;;  %s1412_s18 = sshll.u32 %s1271_s12, 3 }
  0x51   : > { %511 = vmatpush.msra.mxu2 %v429_v0  ;;  %434 = vmatpush.msra.mxu0 %v429_v0  ;;  %v427_v2 = vld [vmem:[#allocation7 + $0x68] sm:$0xff]  ;;  %v426_v3 = vld [vmem:[#allocation7 + $0x60] sm:$0xff]  ;;  %v425_v4 = vld [vmem:[#allocation7 + $0x58] sm:$0xff]  ;;  %s627_s19 = scalar_lea.hbm %s1494_s7, %s1412_s18  ;;  %s405_s20 = scalar_lea.vmem [#allocation11], %s1374_s9 }
  0x52   : > { %v470_v5 = vld [vmem:[#allocation8 + $0x78] sm:$0xff]  ;;  %v469_v6 = vld [vmem:[#allocation8 + $0x70] sm:$0xff]  ;;  %v468_v8 = vld [vmem:[#allocation8 + $0x68] sm:$0xff]  ;;  %s629_s22 = sshll.u32 %s405_s20, 4  ;;  %s631_s2 = sshll.u32 %s627_s19, 4  ;;  %s630_s22 = int_to_ptr.vmem [resolvable:$true] %s629_s22  ;;  %s632_s2 = int_to_ptr.hbm [resolvable:$true] %s631_s2 }
  0x53   : > { %512 = vmatpush.msra.mxu2 %v428_v1  ;;  %435 = vmatpush.msra.mxu0 %v428_v1  ;;  %v424_v7 = vld [vmem:[#allocation7 + $0x50] sm:$0xff]  ;;  %v423_v9 = vld [vmem:[#allocation7 + $0x48] sm:$0xff]  ;;  %v467_v10 = vld [vmem:[#allocation8 + $0x60] sm:$0xff]  ;;  %s1421_s24 = scalar_lea.sflag [#allocation12], %s350_s30  ;;  %s1071_s17 = sshra.s32 %s632_s2, 4  ;;  %s1072_s17 = int_to_ptr.hbm [resolvable:$true] %s1071_s17 }
  0x54   : > { %532 = vmatpush.msra.mxu3 %v470_v5  ;;  %475 = vmatpush.msra.mxu1 %v470_v5  ;;  %v422_v11 = vld [vmem:[#allocation7 + $0x40] sm:$0xff]  ;;  %v466_v12 = vld [vmem:[#allocation8 + $0x58] sm:$0xff]  ;;  %v465_v14 = vld [vmem:[#allocation8 + $0x50] sm:$0xff]  ;;  %s1077_s11 = scalar_lea.hbm %s1494_s7, 16  ;;  %p1078_p7 = scmp.lt.s32.totalorder %s1072_s17, %s1494_s7 }
  0x55   : > { %513 = vmatpush.msra.mxu2 %v427_v2  ;;  %436 = vmatpush.msra.mxu0 %v427_v2  ;;  %v421_v13 = vld [vmem:[#allocation7 + $0x38] sm:$0xff]  ;;  %v420_v15 = vld [vmem:[#allocation7 + $0x30] sm:$0xff]  ;;  %v464_v16 = vld [vmem:[#allocation8 + $0x48] sm:$0xff] }
  0x56   : > { %533 = vmatpush.msra.mxu3 %v469_v6  ;;  %476 = vmatpush.msra.mxu1 %v469_v6  ;;  %v419_v17 = vld [vmem:[#allocation7 + $0x28] sm:$0xff]  ;;  %v463_v18 = vld [vmem:[#allocation8 + $0x40] sm:$0xff]  ;;  %v462_v20 = vld [vmem:[#allocation8 + $0x38] sm:$0xff] }
  0x57   : > { %514 = vmatpush.msra.mxu2 %v426_v3  ;;  %437 = vmatpush.msra.mxu0 %v426_v3  ;;  %v418_v19 = vld [vmem:[#allocation7 + $0x20] sm:$0xff]  ;;  %v417_v21 = vld [vmem:[#allocation7 + $0x18] sm:$0xff]  ;;  %v461_v22 = vld [vmem:[#allocation8 + $0x30] sm:$0xff] }
  0x58   : > { %534 = vmatpush.msra.mxu3 %v468_v8  ;;  %477 = vmatpush.msra.mxu1 %v468_v8  ;;  %v416_v23 = vld [vmem:[#allocation7 + $0x10] sm:$0xff]  ;;  %v460_v24 = vld [vmem:[#allocation8 + $0x28] sm:$0xff]  ;;  %v459_v26 = vld [vmem:[#allocation8 + $0x20] sm:$0xff] }
  0x59   : > { %515 = vmatpush.msra.mxu2 %v425_v4  ;;  %438 = vmatpush.msra.mxu0 %v425_v4  ;;  %v415_v25 = vld [vmem:[#allocation7 + $0x8] sm:$0xff]  ;;  %v414_v27 = vld [vmem:[#allocation7] sm:$0xff]  ;;  %v510_v28 = vld [vmem:[%s354_s23] sm:$0xff] }
  0x5a   : > { %535 = vmatpush.msra.mxu3 %v467_v10  ;;  %478 = vmatpush.msra.mxu1 %v467_v10  ;;  %v413_v29 = vld [vmem:[%s344_s16] sm:$0xff]  ;;  %v458_v30 = vld [vmem:[#allocation8 + $0x18] sm:$0xff]  ;;  %v457_v31 = vld [vmem:[#allocation8 + $0x10] sm:$0xff]  ;;  %s1073_s16 = scalar_lea.hbm %s1072_s17, 8 }
  0x5b   : > { %516 = vmatpush.msra.mxu2 %v424_v7  ;;  %439 = vmatpush.msra.mxu0 %v424_v7  ;;  %v456_v32 = vld [vmem:[#allocation8 + $0x8] sm:$0xff]  ;;  %v455_v33 = vld [vmem:[#allocation8] sm:$0xff]  ;;  %p1074_p1 = scmp.ne.s32.totalorder %s1072_s17, %s1073_s16  ;;  %p1079_p9 = scmp.lt.s32.totalorder %s1077_s11, %s1073_s16 }
  0x5c   : > { %536 = vmatpush.msra.mxu3 %v466_v12  ;;  %479 = vmatpush.msra.mxu1 %v466_v12  ;;  %v931_v34 = vld [vmem:[%s1490_s3] ss:$0 sm:$0xff] }
  0x5d   : > { %517 = vmatpush.msra.mxu2 %v423_v9  ;;  %440 = vmatpush.msra.mxu0 %v423_v9  ;;  %v932_v41 = vld [vmem:[%s1492_s5] ss:$0 sm:$0xff]  ;;  %p1075_p3 = pnand %p1074_p1, %p1318_p4  ;;  %p1080_p8 = por %p1079_p9, %p1078_p7 }
  0x5e   : > { %537 = vmatpush.msra.mxu3 %v465_v14  ;;  %480 = vmatpush.msra.mxu1 %v465_v14 }
  0x5f   : > { %518 = vmatpush.msra.mxu2 %v422_v11  ;;  %441 = vmatpush.msra.mxu0 %v422_v11  ;;  %p1076_p12 = pneg %p1075_p3 }
  0x60   : > { %538 = vmatpush.msra.mxu3 %v464_v16  ;;  %481 = vmatpush.msra.mxu1 %v464_v16 }
  0x61   : > { %519 = vmatpush.msra.mxu2 %v421_v13  ;;  %442 = vmatpush.msra.mxu0 %v421_v13  ;;  %p1081_p10 = pnand %p1080_p8, %p1076_p12 }
  0x62   : > { %539 = vmatpush.msra.mxu3 %v463_v18  ;;  %482 = vmatpush.msra.mxu1 %v463_v18 }
  0x63   : > { %520 = vmatpush.msra.mxu2 %v420_v15  ;;  %443 = vmatpush.msra.mxu0 %v420_v15 }
  0x64   : > { %540 = vmatpush.msra.mxu3 %v462_v20  ;;  %483 = vmatpush.msra.mxu1 %v462_v20 }
  0x65   : > { %521 = vmatpush.msra.mxu2 %v419_v17  ;;  %444 = vmatpush.msra.mxu0 %v419_v17 }
  0x66   : > { %541 = vmatpush.msra.mxu3 %v461_v22  ;;  %484 = vmatpush.msra.mxu1 %v461_v22 }
  0x67   : > { %522 = vmatpush.msra.mxu2 %v418_v19  ;;  %445 = vmatpush.msra.mxu0 %v418_v19 }
  0x68   : > { %542 = vmatpush.msra.mxu3 %v460_v24  ;;  %485 = vmatpush.msra.mxu1 %v460_v24 }
  0x69   : > { %523 = vmatpush.msra.mxu2 %v417_v21  ;;  %446 = vmatpush.msra.mxu0 %v417_v21 }
  0x6a   : > { %543 = vmatpush.msra.mxu3 %v459_v26  ;;  %486 = vmatpush.msra.mxu1 %v459_v26 }
  0x6b   : > { %524 = vmatpush.msra.mxu2 %v416_v23  ;;  %447 = vmatpush.msra.mxu0 %v416_v23 }
  0x6c   : > { %544 = vmatpush.msra.mxu3 %v458_v30  ;;  %487 = vmatpush.msra.mxu1 %v458_v30 }
  0x6d   : > { %525 = vmatpush.msra.mxu2 %v415_v25  ;;  %448 = vmatpush.msra.mxu0 %v415_v25 }
  0x6e   : > { %545 = vmatpush.msra.mxu3 %v457_v31  ;;  %488 = vmatpush.msra.mxu1 %v457_v31 }
  0x6f   : > { %526 = vmatpush.msra.mxu2 %v414_v27  ;;  %449 = vmatpush.msra.mxu0 %v414_v27 }
  0x70   : > { %527 = vmatmul.f32.vlgmr.msra.gmra.mxu2 %v510_v28  ;;  %450 = vmatmul.f32.vlgmr.msra.gmra.mxu0 %v413_v29 }
  0x71   : > { %546 = vmatpush.msra.mxu3 %v456_v32  ;;  %489 = vmatpush.msra.mxu1 %v456_v32 }
  0x73   : > { %547 = vmatpush.msra.mxu3 %v455_v33  ;;  %490 = vmatpush.msra.mxu1 %v455_v33 }
  0xed   : > { %v451_v35 = vpop.f32.mrf.mxu0 }
  0xee   : > { %v452_v36 = vadd.f32 %v931_v34, %v451_v35 }
  0xf0   : > { %v454_v37 = vmax.f32 %v452_v36, 0.0 }
  0xf2   : > { %491 = vmatmul.f32.vlgmr.msra.gmra.mxu1 %v454_v37 }
  0xf3   : > { %v528_v38 = vpop.f32.mrf.mxu2 }
  0xf4   : > { %v529_v39 = vadd.f32 %v931_v34, %v528_v38 }
  0xf6   : > { %v531_v40 = vmax.f32 %v529_v39, 0.0 }
  0xf8   : > { %548 = vmatmul.f32.vlgmr.msra.gmra.mxu3 %v531_v40 }
 0x16f   : > { %v492_v44 = vpop.f32.mrf.mxu1 }
 0x170   : > { %v493_v46 = vadd.f32 %v932_v41, %v492_v44 }
 0x172   : > { %v495_v47 = vmul.f32 %v493_v46, %v493_v46 }
 0x17b   : > { %v549_v42 = vpop.f32.mrf.mxu3 }
 0x17c   : > { %v550_v43 = vadd.f32 %v932_v41, %v549_v42 }
 0x17e   : > { %v552_v45 = vmul.f32 %v550_v43, %v550_v43 }
 0x180   : > { %553 = vadd.xlane.f32.xlu0 %v552_v45 }
 0x188   : > { %496 = vadd.xlane.f32.xlu0 %v495_v47 }
 0x1f3   : > { %v554_v48 = vpop.xlane.xlu0 %553 }
 0x1f4   : > { %v555_v49 = vmax.f32 %v554_v48, 1e-24 }
 0x1f6   : > { %933 = vrsqrt.f32 %v555_v49  ;;  %vm562_vm1 = vweird.f32 %v555_v49 }
 0x1fb   : > { %v497_v50 = vpop.xlane.xlu0 %496 }
 0x1fc   : > { %v934_v51 = vpop.eup %933  ;;  %v498_v52 = vmax.f32 %v497_v50, 1e-24 }
 0x1fd   : > { %v557_v53 = vmul.f32 %v934_v51, %v555_v49  ;;  %vm563_vm0 = vweird.f32 %v934_v51 }
 0x1fe   : > { %935 = vrsqrt.f32 %v498_v52  ;;  %vm564_vm2 = vmor %vm562_vm1, %vm563_vm0  ;;  %vm505_vm4 = vweird.f32 %v498_v52 }
 0x1ff   : > { %v558_v54 = vmul.f32 %v934_v51, %v557_v53 }
 0x201   : > { %v559_v55 = vmul.f32 0.5, %v558_v54 }
 0x203   : > { %v560_v56 = vsub.f32 1.5, %v559_v55 }
 0x204   : > { %v936_v57 = vpop.eup %935 }
 0x205   : > { %v500_v58 = vmul.f32 %v936_v57, %v498_v52  ;;  %v561_v59 = vmul.f32 %v934_v51, %v560_v56  ;;  %vm506_vm3 = vweird.f32 %v936_v57 }
 0x206   : > { %vm507_vm5 = vmor %vm505_vm4, %vm506_vm3 }
 0x207   : > { %v501_v60 = vmul.f32 %v936_v57, %v500_v58  ;;  %v565_v61 = vsel %vm564_vm2, %v934_v51, %v561_v59 }
 0x208   : > { %v566_v62 = vmul.f32 %v565_v61, %v550_v43 }
 0x209   : > { %v502_v63 = vmul.f32 0.5, %v501_v60 }
 0x20a   : > { %568 = vst [vmem:[%s412_s14] sm:$0xff] %v566_v62  ;;  %584 = vmatpush.xpose.msrb.mxu0 %v566_v62 }
 0x20b   : > { %v503_v0 = vsub.f32 1.5, %v502_v63 }
 0x20d   : > { %v504_v1 = vmul.f32 %v936_v57, %v503_v0 }
 0x20f   : > { %v508_v2 = vsel %vm507_vm5, %v936_v57, %v504_v1 }
 0x210   : > { %v509_v3 = vmul.f32 %v508_v2, %v493_v46 }
 0x212   : > { %585 = vmatmul.f32.vlgmr.msrb.gmra.mxu0 %v509_v3  ;;  %567 = vst [vmem:[%s405_s20] sm:$0xff] %v509_v3 }
 0x213   : > { %1084 = shalt.err (!%p1081_p10)
}
 0x214   : > { %859 = dma.vmem_to_hbm [thread:$0]  (%p1318_p4), %s630_s22, 128, %s632_s2, %s1421_s24  }
 0x215   : > { %s641_s4 = scalar_lea.hbm %s1495_s8, %s1412_s18  ;;  %s643_s10 = sshll.u32 %s412_s14, 4  ;;  %s644_s10 = int_to_ptr.vmem [resolvable:$true] %s643_s10 }
 0x216   : > { %s645_s21 = sshll.u32 %s641_s4, 4  ;;  %s1105_s22 = scalar_lea.hbm %s1495_s8, 16  ;;  %s646_s21 = int_to_ptr.hbm [resolvable:$true] %s645_s21 }
 0x217   : > { %s1099_s19 = sshra.s32 %s646_s21, 4  ;;  %s1100_s19 = int_to_ptr.hbm [resolvable:$true] %s1099_s19 }
 0x218   : > { %s1101_s20 = scalar_lea.hbm %s1100_s19, 8  ;;  %p1106_p0 = scmp.lt.s32.totalorder %s1100_s19, %s1495_s8 }
 0x219   : > { %p1102_p11 = scmp.ne.s32.totalorder %s1100_s19, %s1101_s20  ;;  %p1107_p2 = scmp.lt.s32.totalorder %s1105_s22, %s1101_s20 }
 0x21b   : > { %p1103_p5 = pnand %p1102_p11, %p1318_p4  ;;  %p1108_p1 = por %p1107_p2, %p1106_p0 }
 0x21d   : > { %p1104_p13 = pneg %p1103_p5 }
 0x21f   : > { %p1109_p3 = pnand %p1108_p1, %p1104_p13 }
 0x221   : > { %1112 = shalt.err (!%p1109_p3)
}
 0x222   : > { %860 = dma.vmem_to_hbm [thread:$0]  (%p1318_p4), %s644_s10, 128, %s646_s21, %s1421_s24   ;;  %v1201_v4 = vmov 0.0   ;;  %vm590_vm6 = vcmask 64512  }
 0x223   : > { %s398_s14 = scalar_lea.vmem [#allocation10], %s1374_s9  ;;  %s613_s25 = scalar_lea.hbm %s1493_s6, %s1412_s18 }
 0x224   : > { %589 = vst [vmem:[%s398_s14] sm:$0xff] %v1201_v4  ;;  %s615_s26 = sshll.u32 %s398_s14, 4  ;;  %s617_s12 = sshll.u32 %s613_s25, 4  ;;  %s616_s26 = int_to_ptr.vmem [resolvable:$true] %s615_s26  ;;  %s618_s12 = int_to_ptr.hbm [resolvable:$true] %s617_s12 }
 0x225   : > { %s593_s30 = scalar_lea.sflag [#allocation4], %s1371_s29  ;;  %s1127_s4 = sshra.s32 %s618_s12, 4  ;;  %s1128_s4 = int_to_ptr.hbm [resolvable:$true] %s1127_s4 }
 0x226   : > { %s1129_s19 = scalar_lea.hbm %s1128_s4, 8  ;;  %s1133_s10 = scalar_lea.hbm %s1493_s6, 16 }
 0x227   : > { %p1130_p12 = scmp.ne.s32.totalorder %s1128_s4, %s1129_s19  ;;  %p1134_p8 = scmp.lt.s32.totalorder %s1128_s4, %s1493_s6 }
 0x228   : > { %p1135_p10 = scmp.lt.s32.totalorder %s1133_s10, %s1129_s19 }
 0x229   : > { %p1131_p7 = pnand %p1130_p12, %p1318_p4 }
 0x22a   : > { %p1136_p11 = por %p1135_p10, %p1134_p8 }
 0x22b   : > { %p1132_p9 = pneg %p1131_p7 }
 0x22d   : > { %p1137_p5 = pnand %p1136_p11, %p1132_p9 }
 0x28f   : > { %v586_v5 = vpop.f32.mrf.mxu0 }
 0x290   : > { %591 = vst.msk [vmem:[%s398_s14] sm:$0xff] %vm590_vm6, %v586_v5 }
 0x291   : > { %1140 = shalt.err (!%p1137_p5)
}
 0x292   : > { %858 = dma.vmem_to_hbm [thread:$0]  (%p1318_p4), %s616_s26, 128, %s618_s12, %s593_s30  }
 0x293 PF: > { %s1519_s20 = sld [smem:[#allocation21_spill]]  ;;  %s657_s17 = sand.u32 1, %s1183_s27  }
 0x294   : > { %s658_s16 = scalar_lea.sflag [#allocation4], %s657_s17 }
 0x299   : > { %p1520_p13 = scmp.ge.s32.totalorder %s1519_s20, 2 }
 0x29b   : > { %p879_p0 = pnand %p1520_p13, %p1322_p6 }
 0x29d   : > { %p880_p2 = pneg %p879_p0 }
 0x29f   : > { %1174 = dma.done.wait (%p880_p2), %s658_s16, 128  }
 0x2a0   : > { %1176 = vsyncadd (%p880_p2), %s658_s16, 4294967168  ;;  %s1521_s22 = sadd.s32 4294967294, %s1519_s20  }
 0x2a1   : > { %s667_s2 = sand.u32 1, %s1521_s22  }
 0x2a2   : > { %s668_s13 = scalar_lea.sflag [#allocation12], %s667_s2 }
 0x2a3   : > { %1178 = dma.done.wait (%p880_p2), %s668_s13, 256  }
 0x2a4   : > { %1180 = vsyncadd (%p880_p2), %s668_s13, 4294967040  ;;  %s1522_s30 = sld [smem:[#allocation22_spill]]  ;;  %s1525_s27 = smov %s1187_s28 }
 0x2a5   : > { %s1523_s15 = sld [smem:[#allocation20_spill]] }
 0x2a6   : > { %s1524_s29 = sld [smem:[#allocation23_spill]] }
 0x2aa   : > { %p29_p4 = scmp.ge.s32.totalorder %s1522_s30, 4  }
 0x2ab   : > { %s1526_s28 = smov %s1523_s15 }
 0x2ac   :  { %31 = sbr.rel (!%p29_p4) target bundleno = 13 (0xd), region = 142 }
 0x2b1   :  { %684 = vsyncpa [#allocation3], 1 }
 0x2b2   :  { %686 = vsyncpa [#allocation3 + $0x1], 1 }
 0x2b3   :  { %687 = vsyncpa [#allocation6], 1 }
 0x2b4   :  { %689 = vsyncpa [#allocation6 + $0x1], 1 }
 0x2b5   :  { %690 = vsyncpa [#allocation9], 1 }
 0x2b6   :  { %691 = vsyncpa [#allocation4], 1 }
 0x2b7   :  { %693 = vsyncpa [#allocation4 + $0x1], 1 }
 0x2b8   :  { %694 = vsyncpa [#allocation12], 1 }
 0x2b9   :  { %696 = vsyncpa [#allocation12 + $0x1], 1 }

</bundles_post_ra>
